<compile_context>
chip_gen: v5e
topology: v5e:2x2
jax: 0.10.0
libtpu: 0.0.40
codegen_flags: <defaults>
</compile_context>

<pallas_src>
import functools

import jax
import jax.numpy as jnp
from jax.experimental import pallas as pl
from jax.experimental.pallas import tpu as pltpu


def _pick_tile(dim, target, quantum=8):
    """Largest tile t with dim % t == 0 and (t % quantum == 0 or t == dim)."""
    if dim <= target or dim <= quantum:
        return dim
    t = (min(target, dim) // quantum) * quantum
    while t >= quantum:
        if dim % t == 0:
            return t
        t -= quantum
    return dim


def _pick_batch_tile(B, target=8):
    """Batch tile; prefer >= 2 blocks (v7x has 2 TensorCores) while keeping the
    output sublane dim a multiple of 8 or equal to B."""
    tb = _pick_tile(B, target, 8)
    if B // tb >= 2:
        return tb
    for cand in range(min(tb, B // 2), 0, -1):
        if B % cand == 0 and cand % 8 == 0:
            return cand
    return tb


def _vmem_budget():
    """(per-input-buffer block bytes, vmem_limit_bytes) tuned per generation.

    v5e/v6e have 128 MiB VMEM -> bigger sequence tiles; v7x (64 MiB physical,
    32 MiB scoped default) keeps the conservative budget."""
    try:
        cap = getattr(pltpu.get_tpu_info(), "vmem_capacity_bytes", None)
        if cap is not None and cap >= 100 * 1024 * 1024:
            return 24 * 1024 * 1024, 64 * 1024 * 1024
    except Exception:  # pragma: no cover - info query is best-effort only
        pass
    return 8 * 1024 * 1024, 32 * 1024 * 1024


# ---------------------------------------------------------------------------
# Fused kernel: mean over seq axis, then tanh(x @ W1 + b1) @ W2 + b2
# (dropout == identity in eval mode)
# ---------------------------------------------------------------------------
def _classify_header_kernel(x_ref, w1_ref, b1_ref, w2_ref, b2_ref, o_ref,
                            acc_ref, *, inv_seq_len):
    s = pl.program_id(1)

    @pl.when(s == 0)
    def _init():
        acc_ref[...] = jnp.zeros_like(acc_ref)

    # Partial sum over this (TB, TS, D) sequence tile, accumulated in f32.
    acc_ref[...] += jnp.sum(x_ref[...].astype(jnp.float32), axis=1)

    @pl.when(s == pl.num_programs(1) - 1)
    def _finalize():
        pooled = acc_ref[...] * inv_seq_len                    # (TB, D), f32
        # Feed the MXU in the weights' native dtype (full rate for bf16);
        # accumulate in f32 via preferred_element_type.
        h = jnp.dot(pooled.astype(w1_ref.dtype), w1_ref[...],
                    preferred_element_type=jnp.float32)
        h = jnp.tanh(h + b1_ref[...].astype(jnp.float32))
        y = jnp.dot(h.astype(w2_ref.dtype), w2_ref[...],
                    preferred_element_type=jnp.float32)
        o_ref[...] = (y + b2_ref[...].astype(jnp.float32)).astype(o_ref.dtype)


def classify_header_forward(title_hidden, text_hidden, code_hidden, params,
                            out_dtype=None):
    """Pallas equivalent of ClassifyHeader.forward (eval mode)."""
    # text_hidden / code_hidden are unused by the reference forward.
    del text_hidden, code_hidden
    # TODO(synk): nn.Dropout treated as identity (eval mode); training-mode
    # stochastic dropout (pltpu.prng_*) is not implemented.

    w_dense = params["w_dense"]
    b_dense = params["b_dense"]
    w_out = params["w_out"]
    b_out = params["b_out"]

    B, S, D = title_hidden.shape
    C = w_out.shape[1]
    out_dtype = out_dtype or title_hidden.dtype
    itemsize = jnp.dtype(title_hidden.dtype).itemsize

    block_bytes, vmem_limit = _vmem_budget()
    tb = _pick_batch_tile(B, 8)
    # Size the sequence tile so one input buffer stays within block_bytes
    # (x2 for double buffering stays inside the scoped VMEM budget).
    ts_target = max(8, block_bytes // max(1, tb * D * itemsize))
    ts = _pick_tile(S, ts_target, 8)

    grid = (B // tb, S // ts)

    weight_bytes = (w_dense.size * w_dense.dtype.itemsize
                    + w_out.size * w_out.dtype.itemsize
                    + b_dense.size * b_dense.dtype.itemsize
                    + b_out.size * b_out.dtype.itemsize)
    cost = pl.CostEstimate(
        flops=B * S * D + 2 * B * D * D + 2 * B * D * C,
        transcendentals=B * D,
        bytes_accessed=B * S * D * itemsize + weight_bytes
        + B * C * jnp.dtype(out_dtype).itemsize,
    )

    return pl.pallas_call(
        functools.partial(_classify_header_kernel, inv_seq_len=1.0 / S),
        out_shape=jax.ShapeDtypeStruct((B, C), out_dtype),
        grid_spec=pltpu.PrefetchScalarGridSpec(
            num_scalar_prefetch=0,
            grid=grid,
            in_specs=[
                pl.BlockSpec((tb, ts, D), lambda b, s: (b, s, 0)),
                pl.BlockSpec((D, D), lambda b, s: (0, 0)),
                pl.BlockSpec((1, D), lambda b, s: (0, 0)),
                pl.BlockSpec((D, C), lambda b, s: (0, 0)),
                pl.BlockSpec((1, C), lambda b, s: (0, 0)),
            ],
            out_specs=pl.BlockSpec((tb, C), lambda b, s: (b, 0)),
            scratch_shapes=[pltpu.VMEM((tb, D), jnp.float32)],
        ),
        compiler_params=pltpu.CompilerParams(
            dimension_semantics=("parallel", "arbitrary"),
            vmem_limit_bytes=vmem_limit,
        ),
        cost_estimate=cost,
    )(title_hidden, w_dense, b_dense.reshape(1, D), w_out, b_out.reshape(1, C))


if __name__ == "__main__":
    # Small shapes implied by the module: batch=2, seq=8, hidden=32, classes=4.
    B, S, D, C = 2, 8, 32, 4
    key = jax.random.PRNGKey(0)
    k1, k2, k3, k4, k5, k6, k7 = jax.random.split(key, 7)

    title_hidden = jax.random.normal(k1, (B, S, D), dtype=jnp.float32)
    text_hidden = jax.random.normal(k2, (B, S, D), dtype=jnp.float32)
    code_hidden = jax.random.normal(k3, (B, S, D), dtype=jnp.float32)
    params = {
        "w_dense": jax.random.normal(k4, (D, D), jnp.float32) / jnp.sqrt(D),
        "b_dense": jax.random.normal(k5, (D,), jnp.float32) * 0.1,
        "w_out": jax.random.normal(k6, (D, C), jnp.float32) / jnp.sqrt(D),
        "b_out": jax.random.normal(k7, (C,), jnp.float32) * 0.1,
    }

    out = classify_header_forward(title_hidden, text_hidden, code_hidden, params)
    out = jax.block_until_ready(out)

    # --- reference check against a highest-precision plain-JAX forward ---
    hp = jax.lax.Precision.HIGHEST
    pooled_ref = jnp.mean(title_hidden, axis=1)
    ref = jnp.tanh(jnp.dot(pooled_ref, params["w_dense"], precision=hp)
                   + params["b_dense"])
    ref = jnp.dot(ref, params["w_out"], precision=hp) + params["b_out"]
    assert out.shape == (B, C), out.shape
    assert jnp.allclose(out, ref, atol=1e-3, rtol=1e-2), \
        "classify header mismatch vs reference"

    print("KERNEL_OK")
</pallas_src>

<mosaic_0001>
module attributes {stable_mosaic.version = 11 : i64} {
  func.func @_classify_header_kernel(%arg0: i32, %arg1: i32, %arg2: memref<2x8x32xf32, #tpu.memory_space<vmem>>, %arg3: memref<32x32xf32, #tpu.memory_space<vmem>>, %arg4: memref<1x32xf32, #tpu.memory_space<vmem>>, %arg5: memref<32x4xf32, #tpu.memory_space<vmem>>, %arg6: memref<1x4xf32, #tpu.memory_space<vmem>>, %arg7: memref<2x4xf32, #tpu.memory_space<vmem>>, %arg8: memref<2x32xf32, #tpu.memory_space<vmem>>) attributes {dimension_semantics = [#tpu.dimension_semantics<parallel>, #tpu.dimension_semantics<arbitrary>], iteration_bounds = array<i64: 1, 1>, scalar_prefetch = 0 : i64, scratch_operands = 1 : i64, tpu.core_type = #tpu.core_type<tc>, window_params = [{transform_indices = @transform_0, window_bounds = array<i64: 2, 8, 32>}, {pipeline_mode = #tpu.pipeline_mode<synchronous>, transform_indices = @transform_1, window_bounds = array<i64: 32, 32>}, {pipeline_mode = #tpu.pipeline_mode<synchronous>, transform_indices = @transform_2, window_bounds = array<i64: 1, 32>}, {pipeline_mode = #tpu.pipeline_mode<synchronous>, transform_indices = @transform_3, window_bounds = array<i64: 32, 4>}, {pipeline_mode = #tpu.pipeline_mode<synchronous>, transform_indices = @transform_4, window_bounds = array<i64: 1, 4>}, {transform_indices = @transform_5, window_bounds = array<i64: 2, 4>}]} {
    %c0_i32 = arith.constant 0 : i32
    %0 = arith.cmpi eq, %arg1, %c0_i32 : i32
    %1 = arith.extui %0 : i1 to i32
    %c0_i32_0 = arith.constant 0 : i32
    %2 = arith.cmpi ne, %1, %c0_i32_0 : i32
    scf.if %2 {
      %cst_9 = arith.constant 0.000000e+00 : f32
      %11 = vector.broadcast %cst_9 : f32 to vector<2x32xf32>
      %c0_10 = arith.constant 0 : index
      %c0_11 = arith.constant 0 : index
      %12 = vector.load %arg8[%c0_10, %c0_11] : memref<2x32xf32, #tpu.memory_space<vmem>>, vector<2x32xf32>
      tpu.vector_store %arg8[%c0_10, %c0_11], %11 {strides = array<i32>} : memref<2x32xf32, #tpu.memory_space<vmem>>, vector<2x32xf32>,
    } else {
    }
    %c0 = arith.constant 0 : index
    %c0_1 = arith.constant 0 : index
    %3 = vector.load %arg8[%c0, %c0_1] : memref<2x32xf32, #tpu.memory_space<vmem>>, vector<2x32xf32>
    %c0_2 = arith.constant 0 : index
    %c0_3 = arith.constant 0 : index
    %c0_4 = arith.constant 0 : index
    %4 = vector.load %arg2[%c0_2, %c0_3, %c0_4] : memref<2x8x32xf32, #tpu.memory_space<vmem>>, vector<2x8x32xf32>
    %cst = arith.constant dense<0.000000e+00> : vector<2x32xf32>
    %5 = vector.multi_reduction <add>, %4, %cst [1] : vector<2x8x32xf32> to vector<2x32xf32>
    %6 = arith.addf %3, %5 : vector<2x32xf32>
    %c0_5 = arith.constant 0 : index
    %c0_6 = arith.constant 0 : index
    %7 = vector.load %arg8[%c0_5, %c0_6] : memref<2x32xf32, #tpu.memory_space<vmem>>, vector<2x32xf32>
    tpu.vector_store %arg8[%c0_5, %c0_6], %6 {strides = array<i32>} : memref<2x32xf32, #tpu.memory_space<vmem>>, vector<2x32xf32>,
    %c0_i32_7 = arith.constant 0 : i32
    %8 = arith.cmpi eq, %arg1, %c0_i32_7 : i32
    %9 = arith.extui %8 : i1 to i32
    %c0_i32_8 = arith.constant 0 : i32
    %10 = arith.cmpi ne, %9, %c0_i32_8 : i32
    scf.if %10 {
      %c0_9 = arith.constant 0 : index
      %c0_10 = arith.constant 0 : index
      %11 = vector.load %arg8[%c0_9, %c0_10] : memref<2x32xf32, #tpu.memory_space<vmem>>, vector<2x32xf32>
      %cst_11 = arith.constant 1.250000e-01 : f32
      %12 = vector.broadcast %cst_11 : f32 to vector<2x32xf32>
      %13 = arith.mulf %11, %12 : vector<2x32xf32>
      %c0_12 = arith.constant 0 : index
      %c0_13 = arith.constant 0 : index
      %14 = vector.load %arg3[%c0_12, %c0_13] : memref<32x32xf32, #tpu.memory_space<vmem>>, vector<32x32xf32>
      %cst_14 = arith.constant dense<0.000000e+00> : vector<2x32xf32>
      %15 = tpu.matmul %13, %14, %cst_14 {dimension_numbers = #tpu.dot_dimension_numbers<[1], [0], [0], [1], [0, 0, 1, 1], [], []>} : vector<2x32xf32>, vector<32x32xf32>, vector<2x32xf32> -> vector<2x32xf32>
      %c0_15 = arith.constant 0 : index
      %c0_16 = arith.constant 0 : index
      %16 = vector.load %arg4[%c0_15, %c0_16] : memref<1x32xf32, #tpu.memory_space<vmem>>, vector<1x32xf32>
      %17 = vector.broadcast %16 : vector<1x32xf32> to vector<2x32xf32>
      %18 = arith.addf %15, %17 : vector<2x32xf32>
      %19 = math.tanh %18 : vector<2x32xf32>
      %c0_17 = arith.constant 0 : index
      %c0_18 = arith.constant 0 : index
      %20 = vector.load %arg5[%c0_17, %c0_18] : memref<32x4xf32, #tpu.memory_space<vmem>>, vector<32x4xf32>
      %cst_19 = arith.constant dense<0.000000e+00> : vector<2x4xf32>
      %21 = tpu.matmul %19, %20, %cst_19 {dimension_numbers = #tpu.dot_dimension_numbers<[1], [0], [0], [1], [0, 0, 1, 1], [], []>} : vector<2x32xf32>, vector<32x4xf32>, vector<2x4xf32> -> vector<2x4xf32>
      %c0_20 = arith.constant 0 : index
      %c0_21 = arith.constant 0 : index
      %22 = vector.load %arg6[%c0_20, %c0_21] : memref<1x4xf32, #tpu.memory_space<vmem>>, vector<1x4xf32>
      %23 = vector.broadcast %22 : vector<1x4xf32> to vector<2x4xf32>
      %24 = arith.addf %21, %23 : vector<2x4xf32>
      %c0_22 = arith.constant 0 : index
      %c0_23 = arith.constant 0 : index
      %25 = vector.load %arg7[%c0_22, %c0_23] : memref<2x4xf32, #tpu.memory_space<vmem>>, vector<2x4xf32>
      tpu.vector_store %arg7[%c0_22, %c0_23], %24 {strides = array<i32>} : memref<2x4xf32, #tpu.memory_space<vmem>>, vector<2x4xf32>,
    } else {
    }
    return
  }
  func.func @transform_0(%arg0: i32, %arg1: i32) -> (i32, i32, i32) {
    %c0_i32 = arith.constant 0 : i32
    %c0_i32_0 = arith.constant 0 : i32
    return %arg0, %arg1, %c0_i32 : i32, i32, i32
  }
  func.func @transform_1(%arg0: i32, %arg1: i32) -> (i32, i32) {
    %c0_i32 = arith.constant 0 : i32
    %c0_i32_0 = arith.constant 0 : i32
    %c0_i32_1 = arith.constant 0 : i32
    return %c0_i32, %c0_i32_0 : i32, i32
  }
  func.func @transform_2(%arg0: i32, %arg1: i32) -> (i32, i32) {
    %c0_i32 = arith.constant 0 : i32
    %c0_i32_0 = arith.constant 0 : i32
    %c0_i32_1 = arith.constant 0 : i32
    return %c0_i32, %c0_i32_0 : i32, i32
  }
  func.func @transform_3(%arg0: i32, %arg1: i32) -> (i32, i32) {
    %c0_i32 = arith.constant 0 : i32
    %c0_i32_0 = arith.constant 0 : i32
    %c0_i32_1 = arith.constant 0 : i32
    return %c0_i32, %c0_i32_0 : i32, i32
  }
  func.func @transform_4(%arg0: i32, %arg1: i32) -> (i32, i32) {
    %c0_i32 = arith.constant 0 : i32
    %c0_i32_0 = arith.constant 0 : i32
    %c0_i32_1 = arith.constant 0 : i32
    return %c0_i32, %c0_i32_0 : i32, i32
  }
  func.func @transform_5(%arg0: i32, %arg1: i32) -> (i32, i32) {
    %c0_i32 = arith.constant 0 : i32
    %c0_i32_0 = arith.constant 0 : i32
    return %arg0, %c0_i32 : i32, i32
  }
}

</mosaic_0001>

<bundles_post_ra>
// kernel: tpu_custom_call.1
= control target key start
LH: loop header
LB: loop body
LE: loop exit
PB: predicated region body
PF: predicated region fallthrough
CT: control target
= control target key end

     0   :  { %10 = vsyncpa [#allocation4], 0  ;;  %s296_s0 = inlined_call_operand.hbm [shape: f32[2,8,32], index: 0, kind: input, shape index: {}]   ;;  %s297_s1 = inlined_call_operand.vmem [shape: f32[32,32], index: 1, kind: input, shape index: {}]   ;;  %s298_s2 = inlined_call_operand.vmem [shape: f32[1,32], index: 2, kind: input, shape index: {}]   ;;  %s299_s3 = inlined_call_operand.vmem [shape: f32[32,4], index: 3, kind: input, shape index: {}]   ;;  %s300_s4 = inlined_call_operand.vmem [shape: f32[1,4], index: 4, kind: input, shape index: {}]   ;;  %s301_s5 = inlined_call_operand.hbm [shape: f32[2,4], index: 5, kind: output, shape index: {}]  }
   0x1   :  { %11 = vsyncpa [#allocation5], 0  ;;  %s16_s20 = sshll.u32 %s296_s0, 4  ;;  %s219_s21 = smov [#allocation3]   ;;  %s17_s20 = int_to_ptr.hbm [resolvable:$true] %s16_s20 }
   0x2   :  { %s18_s22 = sshll.u32 %s219_s21, 4  ;;  %s220_s23 = smov 128   ;;  %s19_s22 = int_to_ptr.vmem [resolvable:$true] %s18_s22 }
   0x3   :  { %s221_s24 = smov 8  }
   0x4   :  { %24 = dma.hbm_to_vmem [thread:$0]  %s17_s20, 256, %s19_s22, [#allocation4], %s220_s23, %s220_s23, %s221_s24  }
   0x5   :  { %215 = dma.done.wait [#allocation4], 256  }
   0x6   :  { %216 = vsyncadd [#allocation4], 4294967040  ;;  %vm41_vm0 = vcmask 254976   ;;  %v222_v0 = vmov 0.0   ;;  %vm46_vm1 = vcmask 261120   ;;  %v77_v1 = vld [vmem:[%s297_s1 + $0x18] sm:$0xff] }
   0x7   :  { %42 = vst.msk [vmem:[#allocation2] sm:$0x3] %vm41_vm0, %v222_v0  ;;  %v76_v2 = vld [vmem:[%s297_s1 + $0x10] sm:$0xff]  ;;  %97 = vmatpush.msra.mxu0 %v77_v1  ;;  %v44_v3 = vld [vmem:[#allocation3] sm:$0xff]  ;;  %vm63_vm2 = vcmask 1041409   ;;  %v109_v26 = vld [vmem:[%s299_s3 + $0x18] sm:$0xff] }
   0x8   :  { %v75_v4 = vld [vmem:[%s297_s1 + $0x8] sm:$0xff]  ;;  %v47_v6 = vsel %vm46_vm1, %v44_v3, 0.0  ;;  %v74_v9 = vld [vmem:[%s297_s1] sm:$0xff]  ;;  %129 = vmatpush.msra.mxu1 %v109_v26  ;;  %v108_v27 = vld [vmem:[%s299_s3 + $0x10] sm:$0xff]  ;;  %s223_s18 = smov [#allocation6]   ;;  %s146_s21 = sshll.u32 %s301_s5, 4  ;;  %s147_s21 = int_to_ptr.hbm [resolvable:$true] %s146_s21 }
   0x9   :  { %v45_v5 = vld [vmem:[#allocation3 + $0x8] sm:$0xff]  ;;  %98 = vmatpush.msra.mxu0 %v76_v2  ;;  %v48_v7 = vrot.slane %v47_v6, 4  ;;  %v106_v29 = vld [vmem:[%s299_s3] sm:$0xff]  ;;  %s144_s19 = sshll.u32 %s223_s18, 4  ;;  %vm137_vm3 = vcmask 25600   ;;  %s145_s19 = int_to_ptr.vmem [resolvable:$true] %s144_s19 }
   0xa   :  { %v54_v8 = vsel %vm46_vm1, %v45_v5, 0.0  ;;  %v107_v28 = vld [vmem:[%s299_s3 + $0x8] sm:$0xff]  ;;  %130 = vmatpush.msra.mxu1 %v108_v27  ;;  %v163_v30 = vld [vmem:[%s298_s2] ss:$0 sm:$0xff] }
   0xb   :  { %v55_v10 = vrot.slane %v54_v8, 4  ;;  %99 = vmatpush.msra.mxu0 %v75_v4  ;;  %v49_v11 = vadd.f32 %v48_v7, %v47_v6  ;;  %v164_v34 = vld [vmem:[%s300_s4] ss:$0 sm:$0xff] }
   0xc   :  { %131 = vmatpush.msra.mxu1 %v107_v28 }
   0xd   :  { %v56_v12 = vadd.f32 %v55_v10, %v54_v8  ;;  %100 = vmatpush.msra.mxu0 %v74_v9  ;;  %v50_v13 = vrot.slane %v49_v11, 2 }
   0xe   :  { %v43_v20 = vld [vmem:[#allocation2] sm:$0x3]  ;;  %132 = vmatpush.msra.mxu1 %v106_v29 }
   0xf   :  { %v57_v14 = vrot.slane %v56_v12, 2  ;;  %v51_v15 = vadd.f32 %v50_v13, %v49_v11 }
  0x11   :  { %v58_v16 = vadd.f32 %v57_v14, %v56_v12  ;;  %v52_v17 = vrot.slane %v51_v15, 1 }
  0x13   :  { %v59_v18 = vrot.slane %v58_v16, 1  ;;  %v53_v19 = vadd.f32 %v52_v17, %v51_v15 }
  0x15   :  { %v60_v21 = vadd.f32 %v59_v18, %v58_v16 }
  0x17   :  { %v64_v22 = vsel %vm63_vm2, %v60_v21, %v53_v19 }
  0x18   :  { %v66_v23 = vadd.f32 %v64_v22, %v43_v20 }
  0x1a   :  { %68 = vst.msk [vmem:[#allocation2] sm:$0x3] %vm41_vm0, %v66_v23 }
  0x21   :  { %v72_v24 = vld [vmem:[#allocation2] sm:$0x3] }
  0x22   :  { %v73_v25 = vmul.f32 0.125, %v72_v24 }
  0x24   :  { %156 = vmatmul.msk.f32.vlgmr.msra.gmra.mxu0 %vm46_vm1, %v73_v25 }
  0xa1   :  { %v102_v31 = vpop.f32.mrf.mxu0 }
  0xa2   :  { %v103_v32 = vadd.f32 %v163_v30, %v102_v31 }
  0xa4   :  { %165 = vtanh.f32 %v103_v32 }
  0xaa   :  { %v166_v33 = vpop.eup %165 }
  0xab   :  { %157 = vmatmul.msk.f32.vlgmr.msra.gmra.mxu1 %vm46_vm1, %v166_v33 }
 0x128   :  { %v134_v35 = vpop.f32.mrf.mxu1 }
 0x129   :  { %v135_v36 = vadd.f32 %v164_v34, %v134_v35 }
 0x12b   :  { %138 = vst.msk [vmem:[#allocation6] sm:$0x3] %vm137_vm3, %v135_v36 }
 0x12c   :  { %149 = dma.vmem_to_hbm [thread:$0]  %s145_s19, 32, %s147_s21, [#allocation5]  }
 0x12d   :  { %217 = dma.done.wait [#allocation5], 32  }
 0x12e   :  { %218 = vsyncadd [#allocation5], 4294967264 }
 0x12f   :  { %154 = vsyncpa [#allocation4], 1 }
 0x130   :  { %155 = vsyncpa [#allocation5], 1 }

</bundles_post_ra>
